<compile_context>
chip_gen: v7x
topology: tpu7x:2x2x1
jax: 0.10.0
libtpu: 0.0.40
codegen_flags: <defaults>
</compile_context>

<pallas_src>
import functools

import jax
import jax.numpy as jnp
from jax import lax
from jax.experimental import pallas as pl
from jax.experimental.pallas import tpu as pltpu


def _output_process_kernel(x_ref, w_ref, b_ref, o_ref):
    # x_ref: (TF, BS, K)  frame tile of the transformer output (natural layout)
    # w_ref: (N, K)       nn.Linear weight, VMEM-resident across the grid
    # b_ref: (N, 1)       bias column, VMEM-resident
    # o_ref: (BS, N, TF)  already-permuted output tile (frames on lanes: dense vst)
    w = w_ref[...]
    bias = b_ref[...]
    bs = o_ref.shape[0]
    # Static unroll over the (small) batch: each step is a (N, K) x (TF, K)^K
    # contraction that lands frames directly on the output lane axis, so the
    # only cross-lane work is the strided sublane load of x_ref[:, b, :]
    # (XLU work, hidden under the memory-bound pipeline).
    for b in range(bs):
        xb = x_ref[:, b, :]                                   # (TF, K)
        acc = lax.dot_general(                                # (N, TF), f32 acc
            w, xb,
            dimension_numbers=(((1,), (1,)), ((), ())),
            preferred_element_type=jnp.float32)
        o_ref[b, :, :] = (acc + bias).astype(o_ref.dtype)


def _round_up(x, m):
    return -(-int(x) // int(m)) * int(m)


def _vmem_capacity_bytes():
    # Conservative fallback: v7x per-core VMEM (safe everywhere).
    cap = 64 * 1024 * 1024
    try:
        cap = int(pltpu.get_tpu_info().vmem_capacity_bytes)
    except Exception:
        pass
    return max(32 * 1024 * 1024, min(cap, 128 * 1024 * 1024))


def _choose_frame_tile(bs, K, N, itemsize, budget_bytes):
    """Largest frame tile (multiple of 128) whose padded VMEM cost fits budget."""
    bs_pad = _round_up(max(bs, 1), 8)      # sublane padding of the x block
    k_pad = _round_up(K, 128)              # lane padding of the x block
    n_pad = _round_up(N, 8)
    per_frame = (
        2 * bs_pad * k_pad * itemsize      # x block, double-buffered, padded
        + 2 * bs * n_pad * itemsize        # out block, double-buffered
        + (n_pad + k_pad) * 4              # f32 acc + matmul relayout temporaries
    )
    tf = budget_bytes // max(per_frame, 1)
    tf = max(128, min(16384, (tf // 128) * 128))
    return int(tf)


def output_process_pallas(x, w, b, *, frame_tile=None):
    """Fused y = permute(Linear(x), (1,2,0)): (nframes, bs, K) -> (bs, N, nframes)."""
    nframes, bs, K = x.shape
    N, Kw = w.shape
    assert K == Kw
    w = w.astype(x.dtype)
    b2d = b.reshape(N, 1).astype(x.dtype)
    itemsize = jnp.dtype(x.dtype).itemsize

    vmem_cap = _vmem_capacity_bytes()
    if frame_tile is None:
        tf = _choose_frame_tile(bs, K, N, itemsize, budget_bytes=vmem_cap // 2)
    else:
        tf = max(128, (int(frame_tile) // 128) * 128)
    if tf >= nframes:
        tf = nframes                       # single full-extent block
    grid = (pl.cdiv(nframes, tf),)         # ragged tail handled by Pallas masking

    # TODO(synk): confirm on v7x that ("parallel",) shards this 1-D grid across
    # both TensorCores; otherwise split via an explicit leading core axis.
    return pl.pallas_call(
        _output_process_kernel,
        out_shape=jax.ShapeDtypeStruct((bs, N, nframes), x.dtype),
        grid_spec=pltpu.PrefetchScalarGridSpec(
            num_scalar_prefetch=0,
            grid=grid,
            in_specs=[
                pl.BlockSpec((tf, bs, K), lambda i: (i, 0, 0)),  # contiguous frame slab
                pl.BlockSpec((N, K), lambda i: (0, 0)),          # weight (resident)
                pl.BlockSpec((N, 1), lambda i: (0, 0)),          # bias   (resident)
            ],
            out_specs=pl.BlockSpec((bs, N, tf), lambda i: (0, 0, i)),
        ),
        compiler_params=pltpu.CompilerParams(
            dimension_semantics=("parallel",),
            vmem_limit_bytes=int((vmem_cap * 3) // 4),
        ),
    )(x, w, b2d)


@functools.partial(jax.jit, static_argnames=("njoints", "nfeats", "frame_tile"))
def output_process_forward(x, w, b, *, njoints, nfeats, frame_tile=None):
    nframes, bs, _ = x.shape
    y = output_process_pallas(x, w, b, frame_tile=frame_tile)   # (bs, N, nframes)
    # Adjacent-dim split of N = njoints*nfeats: free (metadata-only) reshape.
    return y.reshape(bs, njoints, nfeats, nframes)


class OutputProcessPallas:
    """JAX/Pallas equivalent of the PyTorch OutputProcess module."""

    def __init__(self, data_rep, input_feats, latent_dim, njoints, nfeats, key):
        if data_rep != 'genea_vec':
            raise NotImplementedError("only data_rep='genea_vec' is implemented")
        self.data_rep = data_rep
        self.input_feats = input_feats
        self.latent_dim = latent_dim
        self.njoints = njoints
        self.nfeats = nfeats
        # nn.Linear(latent_dim, input_feats) default init:
        # weight (input_feats, latent_dim), bias (input_feats,), both
        # U(-1/sqrt(latent_dim), 1/sqrt(latent_dim)).
        kw, kb = jax.random.split(key)
        bound = 1.0 / float(jnp.sqrt(jnp.float32(latent_dim)))
        self.w = jax.random.uniform(
            kw, (input_feats, latent_dim), jnp.float32, -bound, bound)   # (N, K)
        self.b = jax.random.uniform(
            kb, (input_feats,), jnp.float32, -bound, bound)              # (N,)

    def __call__(self, output, frame_tile=None):
        # output: (nframes, bs, latent_dim) -> (bs, njoints, nfeats, nframes)
        return output_process_forward(
            output, self.w, self.b,
            njoints=self.njoints, nfeats=self.nfeats, frame_tile=frame_tile)


if __name__ == "__main__":
    key = jax.random.PRNGKey(0)
    k_param, k_x, k_x2 = jax.random.split(key, 3)

    # Small shapes consistent with the module.
    njoints, nfeats = 4, 4
    input_feats = njoints * nfeats        # 16
    latent_dim = 32
    nframes, bs = 8, 2

    module = OutputProcessPallas('genea_vec', input_feats, latent_dim,
                                 njoints, nfeats, k_param)

    def reference(x):
        nf, b_, _ = x.shape
        y = x.reshape(nf * b_, latent_dim) @ module.w.T + module.b
        return y.reshape(nf, b_, njoints, nfeats).transpose(1, 2, 3, 0)

    # Case 1: tiny input, single full-array block.
    x = jax.random.normal(k_x, (nframes, bs, latent_dim), jnp.float32)
    out = jax.block_until_ready(module(x))
    assert out.shape == (bs, njoints, nfeats, nframes)
    assert jnp.allclose(out, reference(x), atol=1e-5, rtol=1e-5)

    # Case 2: multi-block grid with a ragged final frame tile (tile forced to
    # 128 so the masked partial-block path is exercised at small shapes).
    nframes2, bs2 = 300, 3
    x2 = jax.random.normal(k_x2, (nframes2, bs2, latent_dim), jnp.float32)
    out2 = jax.block_until_ready(module(x2, frame_tile=128))
    assert out2.shape == (bs2, njoints, nfeats, nframes2)
    assert jnp.allclose(out2, reference(x2), atol=1e-5, rtol=1e-5)

    print("KERNEL_OK")
</pallas_src>

<mosaic_0001>
module attributes {stable_mosaic.version = 11 : i64} {
  func.func @_output_process_kernel(%arg0: i32, %arg1: memref<8x2x32xf32, #tpu.memory_space<vmem>>, %arg2: memref<16x32xf32, #tpu.memory_space<vmem>>, %arg3: memref<16x1xf32, #tpu.memory_space<vmem>>, %arg4: memref<2x16x8xf32, #tpu.memory_space<vmem>>) attributes {dimension_semantics = [#tpu.dimension_semantics<parallel>], iteration_bounds = array<i64: 1>, scalar_prefetch = 0 : i64, scratch_operands = 0 : i64, tpu.core_type = #tpu.core_type<tc>, window_params = [{transform_indices = @transform_0, window_bounds = array<i64: 8, 2, 32>}, {pipeline_mode = #tpu.pipeline_mode<synchronous>, transform_indices = @transform_1, window_bounds = array<i64: 16, 32>}, {pipeline_mode = #tpu.pipeline_mode<synchronous>, transform_indices = @transform_2, window_bounds = array<i64: 16, 1>}, {transform_indices = @transform_3, window_bounds = array<i64: 2, 16, 8>}]} {
    %c0 = arith.constant 0 : index
    %c0_0 = arith.constant 0 : index
    %0 = vector.load %arg2[%c0, %c0_0] : memref<16x32xf32, #tpu.memory_space<vmem>>, vector<16x32xf32>
    %c0_1 = arith.constant 0 : index
    %c0_2 = arith.constant 0 : index
    %1 = vector.load %arg3[%c0_1, %c0_2] : memref<16x1xf32, #tpu.memory_space<vmem>>, vector<16x1xf32>
    %c0_3 = arith.constant 0 : index
    %c0_4 = arith.constant 0 : index
    %c0_5 = arith.constant 0 : index
    %2 = vector.load %arg1[%c0_3, %c0_4, %c0_5] : memref<8x2x32xf32, #tpu.memory_space<vmem>>, vector<8x1x32xf32>
    %3 = vector.shape_cast %2 : vector<8x1x32xf32> to vector<8x32xf32>
    %cst = arith.constant dense<0.000000e+00> : vector<16x8xf32>
    %4 = tpu.matmul %0, %3, %cst {dimension_numbers = #tpu.dot_dimension_numbers<[1], [1], [0], [0], [0, 0, 1, 0], [], []>} : vector<16x32xf32>, vector<8x32xf32>, vector<16x8xf32> -> vector<16x8xf32>
    %5 = vector.broadcast %1 : vector<16x1xf32> to vector<16x8xf32>
    %6 = arith.addf %4, %5 : vector<16x8xf32>
    %c0_6 = arith.constant 0 : index
    %c0_7 = arith.constant 0 : index
    %c0_8 = arith.constant 0 : index
    %7 = vector.load %arg4[%c0_6, %c0_7, %c0_8] : memref<2x16x8xf32, #tpu.memory_space<vmem>>, vector<1x16x8xf32>
    %8 = vector.shape_cast %7 : vector<1x16x8xf32> to vector<16x8xf32>
    %9 = vector.shape_cast %6 : vector<16x8xf32> to vector<1x16x8xf32>
    tpu.vector_store %arg4[%c0_6, %c0_7, %c0_8], %9 {strides = array<i32>} : memref<2x16x8xf32, #tpu.memory_space<vmem>>, vector<1x16x8xf32>,
    %c0_9 = arith.constant 0 : index
    %c1 = arith.constant 1 : index
    %c0_10 = arith.constant 0 : index
    %10 = vector.load %arg1[%c0_9, %c1, %c0_10] : memref<8x2x32xf32, #tpu.memory_space<vmem>>, vector<8x1x32xf32>
    %11 = vector.shape_cast %10 : vector<8x1x32xf32> to vector<8x32xf32>
    %cst_11 = arith.constant dense<0.000000e+00> : vector<16x8xf32>
    %12 = tpu.matmul %0, %11, %cst_11 {dimension_numbers = #tpu.dot_dimension_numbers<[1], [1], [0], [0], [0, 0, 1, 0], [], []>} : vector<16x32xf32>, vector<8x32xf32>, vector<16x8xf32> -> vector<16x8xf32>
    %13 = vector.broadcast %1 : vector<16x1xf32> to vector<16x8xf32>
    %14 = arith.addf %12, %13 : vector<16x8xf32>
    %c1_12 = arith.constant 1 : index
    %c0_13 = arith.constant 0 : index
    %c0_14 = arith.constant 0 : index
    %15 = vector.load %arg4[%c1_12, %c0_13, %c0_14] : memref<2x16x8xf32, #tpu.memory_space<vmem>>, vector<1x16x8xf32>
    %16 = vector.shape_cast %15 : vector<1x16x8xf32> to vector<16x8xf32>
    %17 = vector.shape_cast %14 : vector<16x8xf32> to vector<1x16x8xf32>
    tpu.vector_store %arg4[%c1_12, %c0_13, %c0_14], %17 {strides = array<i32>} : memref<2x16x8xf32, #tpu.memory_space<vmem>>, vector<1x16x8xf32>,
    return
  }
  func.func @transform_0(%arg0: i32) -> (i32, i32, i32) {
    %c0_i32 = arith.constant 0 : i32
    %c0_i32_0 = arith.constant 0 : i32
    %c0_i32_1 = arith.constant 0 : i32
    return %arg0, %c0_i32, %c0_i32_0 : i32, i32, i32
  }
  func.func @transform_1(%arg0: i32) -> (i32, i32) {
    %c0_i32 = arith.constant 0 : i32
    %c0_i32_0 = arith.constant 0 : i32
    %c0_i32_1 = arith.constant 0 : i32
    return %c0_i32, %c0_i32_0 : i32, i32
  }
  func.func @transform_2(%arg0: i32) -> (i32, i32) {
    %c0_i32 = arith.constant 0 : i32
    %c0_i32_0 = arith.constant 0 : i32
    %c0_i32_1 = arith.constant 0 : i32
    return %c0_i32, %c0_i32_0 : i32, i32
  }
  func.func @transform_3(%arg0: i32) -> (i32, i32, i32) {
    %c0_i32 = arith.constant 0 : i32
    %c0_i32_0 = arith.constant 0 : i32
    %c0_i32_1 = arith.constant 0 : i32
    return %c0_i32, %c0_i32_0, %arg0 : i32, i32, i32
  }
}

</mosaic_0001>

<bundles_post_ra>
// kernel: output_process_forward.1
= control target key start
LH: loop header
LB: loop body
LE: loop exit
PB: predicated region body
PF: predicated region fallthrough
CT: control target
= control target key end

     0   :  { %8 = vsyncpa [#allocation3], 0  ;;  %s501_s0 = inlined_call_operand.vmem [shape: f32[8,2,32], index: 0, kind: input, shape index: {}]   ;;  %s502_s1 = inlined_call_operand.hbm [shape: f32[16,32], index: 1, kind: input, shape index: {}]   ;;  %s503_s2 = inlined_call_operand.vmem [shape: f32[16,1], index: 2, kind: input, shape index: {}]   ;;  %s504_s3 = inlined_call_operand.hbm [shape: f32[2,16,8], index: 3, kind: output, shape index: {}]  }
   0x1   :  { %9 = vsyncpa [#allocation4], 0  ;;  %s370_s12 = smov [#allocation2]   ;;  %s322_s16 = scalar_lea.hbm %s502_s1, 256 }
   0x2   :  { %s17_s13 = sshll.u32 %s370_s12, 4  ;;  %p323_p0 = scmp.ne.s32.totalorder %s502_s1, %s322_s16  ;;  %s18_s13 = int_to_ptr.vmem [resolvable:$true] %s17_s13 }
   0x3   :  { %p326_p1 = scmp.lt.u32.totalorder %s322_s16, %s502_s1 }
   0x5   :  { %p328_p2 = pnand %p326_p1, %p323_p0 }
   0x7   :  { %331 = shalt.err (!%p328_p2)
}
   0x8   :  { %s332_s21 = scalar_lea.vmem %s18_s13, 256  ;;  %p337_p4 = scmp.lt.s32.totalorder %s18_s13, %s18_s13 }
   0x9   :  { %p333_p3 = scmp.ne.s32.totalorder %s18_s13, %s332_s21  ;;  %p338_p5 = scmp.lt.s32.totalorder %s332_s21, %s332_s21 }
   0xb   :  { %p339_p6 = por %p338_p5, %p337_p4 }
   0xd   :  { %p340_p7 = pnand %p339_p6, %p333_p3 }
   0xf   :  { %343 = shalt.err (!%p340_p7)
}
  0x10   :  { %s371_s22 = smov 128   ;;  %s372_s23 = smov 8  }
  0x11   :  { %23 = dma.hbm_to_vmem [thread:$0]  %s502_s1, 256, %s18_s13, [#allocation3], %s371_s22, %s371_s22, %s372_s23  }
  0x12   :  { %366 = dma.done.wait [#allocation3], 256  }
  0x13   :  { %367 = vsyncadd [#allocation3], 4294967040  ;;  %v373_v0 = vmov 0   ;;  %vm60_vm0 = vcmask 1041409   ;;  %vm63_vm1 = vcmask 1042434   ;;  %vm66_vm2 = vcmask 1043459  }
  0x14   :  { %321 = vset.pattern.permute.xlu0 %v373_v0  ;;  %vm69_vm3 = vcmask 1044484   ;;  %vm72_vm4 = vcmask 1045509   ;;  %vm75_vm5 = vcmask 1046534   ;;  %v33_v1 = vld [vmem:[%s501_s0] sm:$0x1]  ;;  %vm80_vm6 = vcmask 261120  }
  0x15   :  { %v34_v2 = vld [vmem:[%s501_s0 + $0x2] sm:$0x1]  ;;  %v35_v3 = vld [vmem:[%s501_s0 + $0x4] sm:$0x1]  ;;  %v36_v4 = vld [vmem:[%s501_s0 + $0x6] sm:$0x1] }
  0x16   :  { %v37_v5 = vld [vmem:[%s501_s0 + $0x8] sm:$0x1]  ;;  %v38_v6 = vld [vmem:[%s501_s0 + $0xa] sm:$0x1]  ;;  %v39_v7 = vld [vmem:[%s501_s0 + $0xc] sm:$0x1] }
  0x17   :  { %v40_v8 = vld [vmem:[%s501_s0 + $0xe] sm:$0x1]  ;;  %v59_v9 = vrot.slane %v34_v2, 7  ;;  %v62_v10 = vrot.slane %v35_v3, 6  ;;  %v65_v11 = vrot.slane %v36_v4, 5  ;;  %v68_v12 = vrot.slane %v37_v5, 4 }
  0x18   :  { %v71_v13 = vrot.slane %v38_v6, 3  ;;  %v167_v14 = vld [vmem:[%s501_s0 + $0x1] sm:$0x1]  ;;  %v74_v16 = vrot.slane %v39_v7, 2  ;;  %v168_v17 = vld [vmem:[%s501_s0 + $0x3] sm:$0x1] }
  0x19   :  { %v61_v15 = vsel %vm60_vm0, %v59_v9, %v33_v1  ;;  %v169_v18 = vld [vmem:[%s501_s0 + $0x5] sm:$0x1]  ;;  %v170_v21 = vld [vmem:[%s501_s0 + $0x7] sm:$0x1]  ;;  %v171_v22 = vld [vmem:[%s501_s0 + $0x9] sm:$0x1] }
  0x1a   :  { %v29_v19 = vld [vmem:[#allocation2] sm:$0xff]  ;;  %v64_v20 = vsel %vm63_vm1, %v62_v10, %v61_v15  ;;  %v172_v23 = vld [vmem:[%s501_s0 + $0xb] sm:$0x1]  ;;  %v77_v25 = vrot.slane %v40_v8, 1  ;;  %v173_v26 = vld [vmem:[%s501_s0 + $0xd] sm:$0x1] }
  0x1b   :  { %308 = vmatprep.mubr.msk.f32.mxu0 %vm80_vm6, %v29_v19  ;;  %313 = vmatprep.mubr.msk.f32.mxu1 %vm80_vm6, %v29_v19  ;;  %v67_v24 = vsel %vm66_vm2, %v65_v11, %v64_v20  ;;  %v183_v27 = vrot.slane %v168_v17, 7  ;;  %v185_v28 = vrot.slane %v169_v18, 6  ;;  %vm78_vm7 = vcmask 1047559   ;;  %v174_v30 = vld [vmem:[%s501_s0 + $0xf] sm:$0x1]  ;;  %v31_v33 = vld [vmem:[%s503_s2] sm:$0xff] }
  0x1c   :  { %v70_v29 = vsel %vm69_vm3, %v68_v12, %v67_v24  ;;  %v187_v31 = vrot.slane %v170_v21, 5  ;;  %v189_v32 = vrot.slane %v171_v22, 4  ;;  %v191_v36 = vrot.slane %v172_v23, 3  ;;  %43 = vperm.xlu0 %321, %v31_v33   ;;  %v32_v40 = vld [vmem:[%s503_s2 + $0x8] sm:$0xff]  ;;  %s374_s0 = smov [#allocation5]  }
  0x1d   :  { %v73_v34 = vsel %vm72_vm4, %v71_v13, %v70_v29  ;;  %v184_v35 = vsel %vm60_vm0, %v183_v27, %v167_v14  ;;  %v193_v39 = vrot.slane %v173_v26, 2  ;;  %v195_v43 = vrot.slane %v174_v30, 1  ;;  %v30_v46 = vld [vmem:[#allocation2 + $0x8] sm:$0xff]  ;;  %s282_s2 = sshll.u32 %s374_s0, 4  ;;  %s283_s2 = int_to_ptr.vmem [resolvable:$true] %s282_s2 }
  0x1e   :  { %v76_v37 = vsel %vm75_vm5, %v74_v16, %v73_v34  ;;  %v186_v38 = vsel %vm63_vm1, %v185_v28, %v184_v35  ;;  %vm164_vm8 = vcmask 64512   ;;  %s344_s8 = scalar_lea.vmem %s283_s2, 512  ;;  %p349_p9 = scmp.lt.s32.totalorder %s283_s2, %s283_s2 }
  0x1f   :  { %v79_v41 = vsel %vm78_vm7, %v77_v25, %v76_v37  ;;  %v188_v42 = vsel %vm66_vm2, %v187_v31, %v186_v38  ;;  %p345_p8 = scmp.ne.s32.totalorder %s283_s2, %s344_s8  ;;  %p350_p10 = scmp.lt.s32.totalorder %s344_s8, %s344_s8 }
  0x20   :  { %306 = vmatprep.subr.msk.mxu0 %vm80_vm6, %v79_v41  ;;  %v190_v44 = vsel %vm69_vm3, %v189_v32, %v188_v42  ;;  %48 = vperm.xlu0 %321, %v32_v40  }
  0x21   :  { %v192_v45 = vsel %vm72_vm4, %v191_v36, %v190_v44  ;;  %307 = vmatpush3.xpose.msk.msra.mxu0 %vm80_vm6, %v79_v41  ;;  %p351_p11 = por %p350_p10, %p349_p9 }
  0x22   :  { %v194_v47 = vsel %vm75_vm5, %v193_v39, %v192_v45 }
  0x23   :  { %v196_v48 = vsel %vm78_vm7, %v195_v43, %v194_v47  ;;  %p352_p12 = pnand %p351_p11, %p345_p8 }
  0x24   :  { %311 = vmatprep.subr.msk.mxu1 %vm80_vm6, %v196_v48  ;;  %309 = vmatmul.mubr.msk.f32.vlgmr.msra.gmra.mrb[0].mxu0 %vm80_vm6, %v30_v46 }
  0x25   :  { %312 = vmatpush3.xpose.msk.msra.mxu1 %vm80_vm6, %v196_v48 }
  0x28   :  { %314 = vmatmul.mubr.msk.f32.vlgmr.msra.gmra.mrb[0].mxu1 %vm80_vm6, %v30_v46 }
  0x9b   :  { %v44_v49 = vpop.permute.xlu0 %43 }
  0x9f   :  { %v49_v50 = vpop.permute.xlu0 %48 }
  0xf7   :  { %v310_v51 = vpop.f32.mrb[0].mxu0 }
  0xf8   :  { %v161_v52 = vadd.f32 %v310_v51, %v49_v50  ;;  %v155_v53 = vpop.f32.mrb[1].mxu0 }
  0xf9   :  { %v156_v54 = vadd.f32 %v155_v53, %v44_v49 }
  0xfa   :  { %166 = vst.msk [vmem:[#allocation5 + $0x8] sm:$0xff] %vm164_vm8, %v161_v52 }
  0xfb   :  { %v315_v55 = vpop.f32.mrb[0].mxu1  ;;  %165 = vst.msk [vmem:[#allocation5] sm:$0xff] %vm164_vm8, %v156_v54 }
  0xfc   :  { %v271_v56 = vadd.f32 %v315_v55, %v49_v50  ;;  %v265_v57 = vpop.f32.mrb[1].mxu1 }
  0xfd   :  { %v266_v58 = vadd.f32 %v265_v57, %v44_v49 }
  0xfe   :  { %276 = vst.msk [vmem:[#allocation5 + $0x18] sm:$0xff] %vm164_vm8, %v271_v56 }
  0xff   :  { %275 = vst.msk [vmem:[#allocation5 + $0x10] sm:$0xff] %vm164_vm8, %v266_v58 }
 0x100   :  { %355 = shalt.err (!%p352_p12)
}
 0x101   :  { %s356_s11 = scalar_lea.hbm %s504_s3, 512 }
 0x102   :  { %p357_p13 = scmp.ne.s32.totalorder %s504_s3, %s356_s11  ;;  %p360_p0 = scmp.lt.u32.totalorder %s356_s11, %s504_s3 }
 0x104   :  { %p362_p1 = pnand %p360_p0, %p357_p13 }
 0x106   :  { %365 = shalt.err (!%p362_p1)
}
 0x107   :  { %288 = dma.vmem_to_hbm [thread:$0]  %s283_s2, 512, %s504_s3, [#allocation4], %s371_s22, %s371_s22, %s372_s23  }
 0x108   :  { %368 = dma.done.wait [#allocation4], 512  }
 0x109   :  { %369 = vsyncadd [#allocation4], 4294966784 }
 0x10a   :  { %292 = vsyncpa [#allocation3], 1 }
 0x10b   :  { %293 = vsyncpa [#allocation4], 1 }

</bundles_post_ra>
